<compile_context>
chip_gen: v5e
topology: v5e:2x2
jax: 0.10.0
libtpu: 0.0.40
codegen_flags: <defaults>
</compile_context>

<pallas_src>
import jax
import jax.numpy as jnp
from jax.experimental import pallas as pl
from jax.experimental.pallas import tpu as pltpu

LANE = 128          # vreg lane width; the batch sits on this axis in-kernel
MAX_TILE_B = 8192   # keeps each [hidden, tile_b] intermediate ~2 MiB (v5e-safe)
MIN_STEPS = 4       # >= 2 grid steps per TensorCore on v7x's 2-TC megacore


def _make_critic_kernel(use_bf16):
    dot_dtype = jnp.bfloat16 if use_bf16 else jnp.float32

    def critic_kernel(obs_ref, w0_ref, b0_ref, w1_ref, b1_ref, w2_ref, b2_ref,
                      v_ref):
        # obs tile arrives in its native [tile_b, obs_dim] layout (no wrapper
        # transpose). Contracting dim 1 of BOTH operands gives the
        # feature-major activation h = W0 @ obs^T directly on the MXU
        # (transposed-RHS matmul) with the batch landing on the lane axis.
        x = obs_ref[...].astype(dot_dtype)                       # [tb, obs_dim]
        dn = (((1,), (1,)), ((), ()))
        h = jax.lax.dot_general(w0_ref[...].astype(dot_dtype), x, dn,
                                preferred_element_type=jnp.float32)
        h = jnp.tanh(h + b0_ref[...])                            # [hidden, tb]
        h = jnp.tanh(
            jnp.dot(w1_ref[...].astype(dot_dtype), h.astype(dot_dtype),
                    preferred_element_type=jnp.float32) + b1_ref[...])
        # Final 1-wide head: VPU broadcast-mul + sublane (XLU) reduce instead
        # of an N=1 MXU matmul; result stays lane-dense for an unmasked store.
        v = jnp.sum(h * w2_ref[...], axis=0, keepdims=True) + b2_ref[0]
        v_ref[...] = v.astype(v_ref.dtype)                       # [1, tb]

    return critic_kernel


def _vmem_footprint_bytes(tile_b, obs_dim, hidden):
    """Estimated live VMEM for one grid step (f32)."""
    f32 = 4
    obs_tile = 2 * tile_b * obs_dim * f32             # double-buffered input tile
    out_tile = 2 * tile_b * 1 * f32                   # double-buffered [1, tb] output
    intermediates = 3 * hidden * tile_b * f32         # h1 / h2 / (h * w2)
    weights = 2 * (hidden * obs_dim + hidden * hidden + 3 * hidden) * f32
    return obs_tile + out_tile + intermediates + weights


def _choose_tile_b(B, obs_dim, hidden, tile_b=None, vmem_budget_bytes=12 << 20):
    """Lane-aligned batch tile from a full-footprint VMEM budget."""
    n_rows = pl.cdiv(B, LANE) * LANE
    if tile_b is not None:
        return max(LANE, min((tile_b // LANE) * LANE, n_rows))
    # Bytes of VMEM held live per batch column (mirrors _vmem_footprint_bytes):
    # 2x obs (double buffer) + 3x hidden (intermediates) + 2x output.
    bytes_per_col = 4 * (2 * obs_dim + 3 * hidden + 2)
    cap = (vmem_budget_bytes // bytes_per_col // LANE) * LANE
    cap = max(LANE, min(cap, MAX_TILE_B))
    # Enough grid steps that each TensorCore (2 on v7x) gets >= 2 steps when
    # the batch allows it, so the obs DMA overlaps with compute per core.
    steps = max(MIN_STEPS, pl.cdiv(n_rows, cap))
    return pl.cdiv(pl.cdiv(n_rows, steps), LANE) * LANE


def critic_forward(obs, params, *, tile_b=None, use_bf16=False):
    """obs: [B, obs_dim] f32. params use PyTorch's [out, in] weight layout.

    Returns [B, 1] f32 values.
    """
    B, obs_dim = obs.shape
    hidden = params["w0"].shape[0]

    tile_b = _choose_tile_b(B, obs_dim, hidden, tile_b)
    n_tiles = pl.cdiv(B, tile_b)
    Bp = n_tiles * tile_b   # only the (1-row) OUTPUT is over-allocated; obs is read as-is

    w0 = params["w0"]                                  # [hidden, obs_dim]
    w1 = params["w1"]                                  # [hidden, hidden]
    w2 = params["w2"].reshape(hidden, 1)               # column for broadcast-mul
    b0 = params["b0"].reshape(hidden, 1)
    b1 = params["b1"].reshape(hidden, 1)
    b2 = params["b2"].reshape(1)                       # SMEM scalar

    flops = 2 * Bp * (obs_dim * hidden + hidden * hidden + hidden)
    bytes_accessed = 4 * (B * obs_dim + Bp + hidden * (obs_dim + hidden + 3) + 1)
    cost = pl.CostEstimate(flops=flops, transcendentals=2 * Bp * hidden,
                           bytes_accessed=bytes_accessed)

    # Explicit scoped-VMEM limit derived from the footprint (2x headroom),
    # never below the smallest default (v5e 16 MiB) nor above 32 MiB so the
    # same number is safe on v5e/v6e (128 MiB phys) and v7x (64 MiB phys).
    vmem_limit = int(min(max(2 * _vmem_footprint_bytes(tile_b, obs_dim, hidden),
                             16 << 20), 32 << 20))

    v_t = pl.pallas_call(
        _make_critic_kernel(use_bf16),
        out_shape=jax.ShapeDtypeStruct((1, Bp), jnp.float32),
        grid=(n_tiles,),
        in_specs=[
            pl.BlockSpec((tile_b, obs_dim), lambda i: (i, 0)),   # obs, native layout
            pl.BlockSpec((hidden, obs_dim), lambda i: (0, 0)),   # w0 (resident)
            pl.BlockSpec((hidden, 1),       lambda i: (0, 0)),   # b0
            pl.BlockSpec((hidden, hidden),  lambda i: (0, 0)),   # w1
            pl.BlockSpec((hidden, 1),       lambda i: (0, 0)),   # b1
            pl.BlockSpec((hidden, 1),       lambda i: (0, 0)),   # w2
            pl.BlockSpec(memory_space=pltpu.MemorySpace.SMEM),   # b2 scalar
        ],
        out_specs=pl.BlockSpec((1, tile_b), lambda i: (0, i)),   # lane-dense output
        compiler_params=pltpu.CompilerParams(
            dimension_semantics=("parallel",),
            vmem_limit_bytes=vmem_limit),
        cost_estimate=cost,
    )(obs, w0, b0, w1, b1, w2, b2)

    return v_t[0, :B].reshape(B, 1)


def init_critic_params(key, obs_dim, hidden_dim=64):
    """Deterministic init mimicking init_layer (orthogonal weights, zero bias).

    Weights are stored in PyTorch layout: [out_features, in_features].
    """
    k0, k1, k2 = jax.random.split(key, 3)
    ortho = jax.nn.initializers.orthogonal
    std2 = 2.0 ** 0.5
    w0 = ortho(scale=std2)(k0, (hidden_dim, obs_dim), jnp.float32)
    w1 = ortho(scale=std2)(k1, (hidden_dim, hidden_dim), jnp.float32)
    w2 = ortho(scale=1.0)(k2, (1, hidden_dim), jnp.float32)
    return {
        "w0": w0, "b0": jnp.zeros((hidden_dim,), jnp.float32),
        "w1": w1, "b1": jnp.zeros((hidden_dim,), jnp.float32),
        "w2": w2, "b2": jnp.zeros((1,), jnp.float32),
    }


def critic_ref(obs, params):
    """Pure-JAX reference (PyTorch semantics: x @ W.T + b)."""
    h = jnp.tanh(obs @ params["w0"].T + params["b0"])
    h = jnp.tanh(h @ params["w1"].T + params["b1"])
    return h @ params["w2"].T + params["b2"]


if __name__ == "__main__":
    key = jax.random.PRNGKey(0)
    k_param, k_obs = jax.random.split(key)

    B, obs_dim, hidden = 8, 32, 64          # small shapes; batch lane-padded in the grid only
    params = init_critic_params(k_param, obs_dim, hidden)
    obs = jax.random.normal(k_obs, (B, obs_dim), jnp.float32)

    # Default f32 path: verify achieved error against the PyTorch-semantics
    # reference at 1e-5 (covers the f32-MXU-emulation correctness concern).
    v = jax.block_until_ready(critic_forward(obs, params))
    v_ref = critic_ref(obs, params)
    assert v.shape == (B, 1), v.shape
    assert jnp.allclose(v, v_ref, atol=1e-5, rtol=1e-5), (v, v_ref)

    # Ragged multi-tile path: partial last obs block handled by Pallas' masked
    # block DMA (no wrapper-side padding), padded output columns sliced off.
    B2 = 300
    obs2 = jax.random.normal(jax.random.PRNGKey(1), (B2, obs_dim), jnp.float32)
    v2 = jax.block_until_ready(critic_forward(obs2, params, tile_b=128))
    assert jnp.allclose(v2, critic_ref(obs2, params), atol=1e-5, rtol=1e-5)

    # Optional bf16-MXU-operand path (single-pass matmuls), looser tolerance.
    v3 = jax.block_until_ready(critic_forward(obs2, params, use_bf16=True))
    assert jnp.allclose(v3, critic_ref(obs2, params), atol=1e-1, rtol=1e-1)

    print("KERNEL_OK")
</pallas_src>

<mosaic_0001>
module attributes {stable_mosaic.version = 11 : i64} {
  func.func @critic_kernel(%arg0: i32, %arg1: memref<128x32xf32, #tpu.memory_space<vmem>>, %arg2: memref<64x32xf32, #tpu.memory_space<vmem>>, %arg3: memref<64x1xf32, #tpu.memory_space<vmem>>, %arg4: memref<64x64xf32, #tpu.memory_space<vmem>>, %arg5: memref<64x1xf32, #tpu.memory_space<vmem>>, %arg6: memref<64x1xf32, #tpu.memory_space<vmem>>, %arg7: memref<1xf32, #tpu.memory_space<smem>>, %arg8: memref<1x128xf32, #tpu.memory_space<vmem>>) attributes {dimension_semantics = [#tpu.dimension_semantics<parallel>], iteration_bounds = array<i64: 1>, scalar_prefetch = 0 : i64, scratch_operands = 0 : i64, tpu.core_type = #tpu.core_type<tc>, window_params = [{transform_indices = @transform_0, window_bounds = array<i64: 128, 32>}, {pipeline_mode = #tpu.pipeline_mode<synchronous>, transform_indices = @transform_1, window_bounds = array<i64: 64, 32>}, {pipeline_mode = #tpu.pipeline_mode<synchronous>, transform_indices = @transform_2, window_bounds = array<i64: 64, 1>}, {pipeline_mode = #tpu.pipeline_mode<synchronous>, transform_indices = @transform_3, window_bounds = array<i64: 64, 64>}, {pipeline_mode = #tpu.pipeline_mode<synchronous>, transform_indices = @transform_4, window_bounds = array<i64: 64, 1>}, {pipeline_mode = #tpu.pipeline_mode<synchronous>, transform_indices = @transform_5, window_bounds = array<i64: 64, 1>}, {transform_indices = @transform_6, window_bounds = array<i64: 1>}, {transform_indices = @transform_7, window_bounds = array<i64: 1, 128>}]} {
    %c0 = arith.constant 0 : index
    %c0_0 = arith.constant 0 : index
    %0 = vector.load %arg1[%c0, %c0_0] : memref<128x32xf32, #tpu.memory_space<vmem>>, vector<128x32xf32>
    %c0_1 = arith.constant 0 : index
    %c0_2 = arith.constant 0 : index
    %1 = vector.load %arg2[%c0_1, %c0_2] : memref<64x32xf32, #tpu.memory_space<vmem>>, vector<64x32xf32>
    %cst = arith.constant dense<0.000000e+00> : vector<64x128xf32>
    %2 = tpu.matmul %1, %0, %cst {dimension_numbers = #tpu.dot_dimension_numbers<[1], [1], [0], [0], [0, 0, 1, 0], [], []>} : vector<64x32xf32>, vector<128x32xf32>, vector<64x128xf32> -> vector<64x128xf32>
    %c0_3 = arith.constant 0 : index
    %c0_4 = arith.constant 0 : index
    %3 = vector.load %arg3[%c0_3, %c0_4] : memref<64x1xf32, #tpu.memory_space<vmem>>, vector<64x1xf32>
    %4 = vector.broadcast %3 : vector<64x1xf32> to vector<64x128xf32>
    %5 = arith.addf %2, %4 : vector<64x128xf32>
    %6 = math.tanh %5 : vector<64x128xf32>
    %c0_5 = arith.constant 0 : index
    %c0_6 = arith.constant 0 : index
    %7 = vector.load %arg4[%c0_5, %c0_6] : memref<64x64xf32, #tpu.memory_space<vmem>>, vector<64x64xf32>
    %cst_7 = arith.constant dense<0.000000e+00> : vector<64x128xf32>
    %8 = tpu.matmul %7, %6, %cst_7 {dimension_numbers = #tpu.dot_dimension_numbers<[1], [0], [0], [1], [0, 0, 1, 1], [], []>} : vector<64x64xf32>, vector<64x128xf32>, vector<64x128xf32> -> vector<64x128xf32>
    %c0_8 = arith.constant 0 : index
    %c0_9 = arith.constant 0 : index
    %9 = vector.load %arg5[%c0_8, %c0_9] : memref<64x1xf32, #tpu.memory_space<vmem>>, vector<64x1xf32>
    %10 = vector.broadcast %9 : vector<64x1xf32> to vector<64x128xf32>
    %11 = arith.addf %8, %10 : vector<64x128xf32>
    %12 = math.tanh %11 : vector<64x128xf32>
    %c0_10 = arith.constant 0 : index
    %c0_11 = arith.constant 0 : index
    %13 = vector.load %arg6[%c0_10, %c0_11] : memref<64x1xf32, #tpu.memory_space<vmem>>, vector<64x1xf32>
    %14 = vector.broadcast %13 : vector<64x1xf32> to vector<64x128xf32>
    %15 = arith.mulf %12, %14 : vector<64x128xf32>
    %cst_12 = arith.constant dense<0.000000e+00> : vector<128xf32>
    %16 = vector.multi_reduction <add>, %15, %cst_12 [0] : vector<64x128xf32> to vector<128xf32>
    %17 = vector.shape_cast %16 : vector<128xf32> to vector<1x128xf32>
    %c0_13 = arith.constant 0 : index
    %18 = memref.load %arg7[%c0_13] : memref<1xf32, #tpu.memory_space<smem>>
    %19 = vector.broadcast %18 : f32 to vector<1x128xf32>
    %20 = arith.addf %17, %19 : vector<1x128xf32>
    %c0_14 = arith.constant 0 : index
    %c0_15 = arith.constant 0 : index
    %21 = vector.load %arg8[%c0_14, %c0_15] : memref<1x128xf32, #tpu.memory_space<vmem>>, vector<1x128xf32>
    tpu.vector_store %arg8[%c0_14, %c0_15], %20 {strides = array<i32>} : memref<1x128xf32, #tpu.memory_space<vmem>>, vector<1x128xf32>,
    return
  }
  func.func @transform_0(%arg0: i32) -> (i32, i32) {
    %c0_i32 = arith.constant 0 : i32
    %c0_i32_0 = arith.constant 0 : i32
    return %arg0, %c0_i32 : i32, i32
  }
  func.func @transform_1(%arg0: i32) -> (i32, i32) {
    %c0_i32 = arith.constant 0 : i32
    %c0_i32_0 = arith.constant 0 : i32
    %c0_i32_1 = arith.constant 0 : i32
    return %c0_i32, %c0_i32_0 : i32, i32
  }
  func.func @transform_2(%arg0: i32) -> (i32, i32) {
    %c0_i32 = arith.constant 0 : i32
    %c0_i32_0 = arith.constant 0 : i32
    %c0_i32_1 = arith.constant 0 : i32
    return %c0_i32, %c0_i32_0 : i32, i32
  }
  func.func @transform_3(%arg0: i32) -> (i32, i32) {
    %c0_i32 = arith.constant 0 : i32
    %c0_i32_0 = arith.constant 0 : i32
    %c0_i32_1 = arith.constant 0 : i32
    return %c0_i32, %c0_i32_0 : i32, i32
  }
  func.func @transform_4(%arg0: i32) -> (i32, i32) {
    %c0_i32 = arith.constant 0 : i32
    %c0_i32_0 = arith.constant 0 : i32
    %c0_i32_1 = arith.constant 0 : i32
    return %c0_i32, %c0_i32_0 : i32, i32
  }
  func.func @transform_5(%arg0: i32) -> (i32, i32) {
    %c0_i32 = arith.constant 0 : i32
    %c0_i32_0 = arith.constant 0 : i32
    %c0_i32_1 = arith.constant 0 : i32
    return %c0_i32, %c0_i32_0 : i32, i32
  }
  func.func @transform_6(%arg0: i32) -> i32 {
    %c0_i32 = arith.constant 0 : i32
    %c0_i32_0 = arith.constant 0 : i32
    return %c0_i32 : i32
  }
  func.func @transform_7(%arg0: i32) -> (i32, i32) {
    %c0_i32 = arith.constant 0 : i32
    %c0_i32_0 = arith.constant 0 : i32
    return %c0_i32, %arg0 : i32, i32
  }
}

</mosaic_0001>

<bundles_post_ra>
// kernel: tpu_custom_call.1
= control target key start
LH: loop header
LB: loop body
LE: loop exit
PB: predicated region body
PF: predicated region fallthrough
CT: control target
= control target key end

     0   :  { %vm100_vm0 = vcmask 261120   ;;  %v568_v2 = vmov 0   ;;  %s848_s0 = inlined_call_operand.vmem [shape: f32[8,32], index: 0, kind: input, shape index: {}]   ;;  %s849_s1 = inlined_call_operand.vmem [shape: f32[64,32], index: 1, kind: input, shape index: {}]   ;;  %s850_s2 = inlined_call_operand.vmem [shape: f32[64,1], index: 2, kind: input, shape index: {}]   ;;  %s851_s3 = inlined_call_operand.vmem [shape: f32[64,64], index: 3, kind: input, shape index: {}]   ;;  %s852_s4 = inlined_call_operand.vmem [shape: f32[64,1], index: 4, kind: input, shape index: {}]   ;;  %s853_s5 = inlined_call_operand.vmem [shape: f32[64,1], index: 5, kind: input, shape index: {}]   ;;  %s854_s6 = inlined_call_operand.<no memory space> [shape: f32[1], index: 6, kind: input, shape index: {}]   ;;  %s855_s7 = inlined_call_operand.hbm [shape: f32[1,128], index: 7, kind: output, shape index: {}]  }
   0x1   :  { %v43_v0 = vld [vmem:[%s848_s0 + $0x78] sm:$0xff]  ;;  %v42_v1 = vld [vmem:[%s848_s0 + $0x70] sm:$0xff]  ;;  %507 = vset.pattern.permute.xlu0 %v568_v2  ;;  %508 = vset.pattern.permute.xlu1 %v568_v2 }
   0x2   :  { %473 = vmatpush.xpose.msk.msra.mxu2 %vm100_vm0, %v43_v0  ;;  %474 = vmatpush.xpose.msk.msra.mxu3 %vm100_vm0, %v43_v0  ;;  %v59_v3 = vld [vmem:[%s850_s2 + $0x38] sm:$0xff] }
   0x3   :  { %441 = vmatpush.xpose.msk.msra.mxu0 %vm100_vm0, %v43_v0  ;;  %509 = vset.pattern.permute.xlu2 %v568_v2 }
   0x4   :  { %13 = vsyncpa [#allocation4], 0  ;;  %97 = vperm.xlu0 %507, %v59_v3   ;;  %v57_v4 = vld [vmem:[%s850_s2 + $0x28] sm:$0xff]  ;;  %v58_v6 = vld [vmem:[%s850_s2 + $0x30] sm:$0xff]  ;;  %vm278_vm1 = vcmask 523264   ;;  %s569_s13 = smov [#allocation3]  }
   0x5   :  { %v41_v5 = vld [vmem:[%s848_s0 + $0x68] sm:$0xff]  ;;  %87 = vperm.xlu1 %508, %v57_v4   ;;  %v40_v7 = vld [vmem:[%s848_s0 + $0x60] sm:$0xff]  ;;  %v39_v9 = vld [vmem:[%s848_s0 + $0x58] sm:$0xff]  ;;  %s430_s14 = sshll.u32 %s569_s13, 4  ;;  %s432_s17 = sshll.u32 %s855_s7, 4  ;;  %s431_s14 = int_to_ptr.vmem [resolvable:$true] %s430_s14  ;;  %s433_s17 = int_to_ptr.hbm [resolvable:$true] %s432_s17 }
   0x6   :  { %475 = vmatpush.xpose.msk.msra.mxu2 %vm100_vm0, %v42_v1  ;;  %476 = vmatpush.xpose.msk.msra.mxu3 %vm100_vm0, %v42_v1  ;;  %v56_v8 = vld [vmem:[%s850_s2 + $0x20] sm:$0xff]  ;;  %v53_v10 = vld [vmem:[%s850_s2 + $0x8] sm:$0xff]  ;;  %v38_v11 = vld [vmem:[%s848_s0 + $0x50] sm:$0xff] }
   0x7   :  { %442 = vmatpush.xpose.msk.msra.mxu0 %vm100_vm0, %v42_v1  ;;  %v52_v12 = vld [vmem:[%s850_s2] sm:$0xff]  ;;  %v37_v13 = vld [vmem:[%s848_s0 + $0x48] sm:$0xff]  ;;  %v232_v16 = vld [vmem:[%s852_s4 + $0x10] sm:$0xff] }
   0x8   :  { %v231_v14 = vld [vmem:[%s852_s4 + $0x8] sm:$0xff]  ;;  %v36_v15 = vld [vmem:[%s848_s0 + $0x40] sm:$0xff]  ;;  %v35_v17 = vld [vmem:[%s848_s0 + $0x38] sm:$0xff] }
   0x9   :  { %v55_v18 = vld [vmem:[%s850_s2 + $0x18] sm:$0xff]  ;;  %v234_v19 = vld [vmem:[%s852_s4 + $0x20] sm:$0xff]  ;;  %v34_v20 = vld [vmem:[%s848_s0 + $0x30] sm:$0xff] }
   0xa   :  { %477 = vmatpush.xpose.msk.msra.mxu2 %vm100_vm0, %v41_v5  ;;  %478 = vmatpush.xpose.msk.msra.mxu3 %vm100_vm0, %v41_v5  ;;  %v235_v21 = vld [vmem:[%s852_s4 + $0x28] sm:$0xff]  ;;  %v54_v23 = vld [vmem:[%s850_s2 + $0x10] sm:$0xff]  ;;  %v32_v25 = vld [vmem:[%s848_s0 + $0x20] sm:$0xff] }
   0xb   :  { %443 = vmatpush.xpose.msk.msra.mxu0 %vm100_vm0, %v41_v5  ;;  %77 = vperm.xlu2 %509, %v55_v18   ;;  %v33_v22 = vld [vmem:[%s848_s0 + $0x28] sm:$0xff]  ;;  %v236_v26 = vld [vmem:[%s852_s4 + $0x30] sm:$0xff]  ;;  %v31_v27 = vld [vmem:[%s848_s0 + $0x18] sm:$0xff] }
   0xc   :  { %92 = vperm.xlu0 %507, %v58_v6   ;;  %v353_v24 = vld [vmem:[%s853_s5 + $0x8] sm:$0xff]  ;;  %v230_v28 = vld [vmem:[%s852_s4] sm:$0xff]  ;;  %v237_v29 = vld [vmem:[%s852_s4 + $0x38] sm:$0xff] }
   0xd   :  { %82 = vperm.xlu1 %508, %v56_v8   ;;  %v30_v30 = vld [vmem:[%s848_s0 + $0x10] sm:$0xff]  ;;  %v355_v31 = vld [vmem:[%s853_s5 + $0x18] sm:$0xff]  ;;  %v29_v32 = vld [vmem:[%s848_s0 + $0x8] sm:$0xff] }
   0xe   :  { %479 = vmatpush.xpose.msk.msra.mxu2 %vm100_vm0, %v40_v7  ;;  %480 = vmatpush.xpose.msk.msra.mxu3 %vm100_vm0, %v40_v7  ;;  %v233_v33 = vld [vmem:[%s852_s4 + $0x18] sm:$0xff]  ;;  %v357_v34 = vld [vmem:[%s853_s5 + $0x28] sm:$0xff]  ;;  %v28_v35 = vld [vmem:[%s848_s0] sm:$0xff] }
   0xf   :  { %444 = vmatpush.xpose.msk.msra.mxu0 %vm100_vm0, %v40_v7  ;;  %v358_v36 = vld [vmem:[%s853_s5 + $0x30] sm:$0xff]  ;;  %v49_v38 = vld [vmem:[%s849_s1 + $0x28] sm:$0xff]  ;;  %v44_v39 = vld [vmem:[%s849_s1] sm:$0xff] }
  0x10   :  { %v46_v37 = vld [vmem:[%s849_s1 + $0x10] sm:$0xff]  ;;  %v352_v40 = vld [vmem:[%s853_s5] sm:$0xff]  ;;  %v47_v41 = vld [vmem:[%s849_s1 + $0x18] sm:$0xff] }
  0x11   :  { %v50_v42 = vld [vmem:[%s849_s1 + $0x30] sm:$0xff]  ;;  %v45_v43 = vld [vmem:[%s849_s1 + $0x8] sm:$0xff]  ;;  %v48_v45 = vld [vmem:[%s849_s1 + $0x20] sm:$0xff] }
  0x12   :  { %481 = vmatpush.xpose.msk.msra.mxu2 %vm100_vm0, %v39_v9  ;;  %482 = vmatpush.xpose.msk.msra.mxu3 %vm100_vm0, %v39_v9  ;;  %v354_v44 = vld [vmem:[%s853_s5 + $0x10] sm:$0xff]  ;;  %v51_v46 = vld [vmem:[%s849_s1 + $0x38] sm:$0xff]  ;;  %v356_v47 = vld [vmem:[%s853_s5 + $0x20] sm:$0xff] }
  0x13   :  { %445 = vmatpush.xpose.msk.msra.mxu0 %vm100_vm0, %v39_v9  ;;  %72 = vperm.xlu2 %509, %v54_v23   ;;  %v359_v48 = vld [vmem:[%s853_s5 + $0x38] sm:$0xff]  ;;  %v223_v18 = vld [vmem:[%s851_s3 + $0x8] sm:$0xff]  ;;  %v228_v23 = vld [vmem:[%s851_s3 + $0x30] sm:$0xff] }
  0x14   :  { %67 = vperm.xlu0 %507, %v53_v10  }
  0x15   :  { %62 = vperm.xlu1 %508, %v52_v12  }
  0x16   :  { %483 = vmatpush.xpose.msk.msra.mxu2 %vm100_vm0, %v38_v11  ;;  %484 = vmatpush.xpose.msk.msra.mxu3 %vm100_vm0, %v38_v11 }
  0x17   :  { %446 = vmatpush.xpose.msk.msra.mxu0 %vm100_vm0, %v38_v11 }
  0x1a   :  { %485 = vmatpush.xpose.msk.msra.mxu2 %vm100_vm0, %v37_v13  ;;  %486 = vmatpush.xpose.msk.msra.mxu3 %vm100_vm0, %v37_v13 }
  0x1b   :  { %447 = vmatpush.xpose.msk.msra.mxu0 %vm100_vm0, %v37_v13  ;;  %240 = vperm.xlu2 %509, %v230_v28  }
  0x1c   :  { %245 = vperm.xlu0 %507, %v231_v14  }
  0x1d   :  { %250 = vperm.xlu1 %508, %v232_v16   ;;  %v222_v16 = vld [vmem:[%s851_s3] sm:$0xff] }
  0x1e   :  { %487 = vmatpush.xpose.msk.msra.mxu2 %vm100_vm0, %v36_v15  ;;  %488 = vmatpush.xpose.msk.msra.mxu3 %vm100_vm0, %v36_v15 }
  0x1f   :  { %448 = vmatpush.xpose.msk.msra.mxu0 %vm100_vm0, %v36_v15 }
  0x22   :  { %489 = vmatpush.xpose.msk.msra.mxu2 %vm100_vm0, %v35_v17  ;;  %490 = vmatpush.xpose.msk.msra.mxu3 %vm100_vm0, %v35_v17 }
  0x23   :  { %449 = vmatpush.xpose.msk.msra.mxu0 %vm100_vm0, %v35_v17  ;;  %255 = vperm.xlu2 %509, %v233_v33  }
  0x24   :  { %260 = vperm.xlu0 %507, %v234_v19   ;;  %v224_v19 = vld [vmem:[%s851_s3 + $0x10] sm:$0xff] }
  0x25   :  { %265 = vperm.xlu1 %508, %v235_v21   ;;  %v226_v21 = vld [vmem:[%s851_s3 + $0x20] sm:$0xff] }
  0x26   :  { %491 = vmatpush.xpose.msk.msra.mxu2 %vm100_vm0, %v34_v20  ;;  %492 = vmatpush.xpose.msk.msra.mxu3 %vm100_vm0, %v34_v20 }
  0x27   :  { %450 = vmatpush.xpose.msk.msra.mxu0 %vm100_vm0, %v34_v20  ;;  %v225_v20 = vld [vmem:[%s851_s3 + $0x18] sm:$0xff] }
  0x2a   :  { %493 = vmatpush.xpose.msk.msra.mxu2 %vm100_vm0, %v33_v22  ;;  %494 = vmatpush.xpose.msk.msra.mxu3 %vm100_vm0, %v33_v22 }
  0x2b   :  { %451 = vmatpush.xpose.msk.msra.mxu0 %vm100_vm0, %v33_v22  ;;  %362 = vperm.xlu2 %509, %v352_v40   ;;  %v227_v22 = vld [vmem:[%s851_s3 + $0x28] sm:$0xff] }
  0x2c   :  { %367 = vperm.xlu0 %507, %v353_v24   ;;  %v229_v24 = vld [vmem:[%s851_s3 + $0x38] sm:$0xff] }
  0x2d   :  { %270 = vperm.xlu1 %508, %v236_v26  }
  0x2e   :  { %495 = vmatpush.xpose.msk.msra.mxu2 %vm100_vm0, %v32_v25  ;;  %496 = vmatpush.xpose.msk.msra.mxu3 %vm100_vm0, %v32_v25 }
  0x2f   :  { %452 = vmatpush.xpose.msk.msra.mxu0 %vm100_vm0, %v32_v25 }
  0x32   :  { %497 = vmatpush.xpose.msk.msra.mxu2 %vm100_vm0, %v31_v27  ;;  %498 = vmatpush.xpose.msk.msra.mxu3 %vm100_vm0, %v31_v27 }
  0x33   :  { %453 = vmatpush.xpose.msk.msra.mxu0 %vm100_vm0, %v31_v27  ;;  %372 = vperm.xlu2 %509, %v354_v44  }
  0x34   :  { %275 = vperm.xlu0 %507, %v237_v29  }
  0x35   :  { %377 = vperm.xlu1 %508, %v355_v31  }
  0x36   :  { %499 = vmatpush.xpose.msk.msra.mxu2 %vm100_vm0, %v30_v30  ;;  %500 = vmatpush.xpose.msk.msra.mxu3 %vm100_vm0, %v30_v30 }
  0x37   :  { %454 = vmatpush.xpose.msk.msra.mxu0 %vm100_vm0, %v30_v30 }
  0x3a   :  { %501 = vmatpush.xpose.msk.msra.mxu2 %vm100_vm0, %v29_v32  ;;  %502 = vmatpush.xpose.msk.msra.mxu3 %vm100_vm0, %v29_v32 }
  0x3b   :  { %455 = vmatpush.xpose.msk.msra.mxu0 %vm100_vm0, %v29_v32  ;;  %382 = vperm.xlu2 %509, %v356_v47  }
  0x3c   :  { %387 = vperm.xlu0 %507, %v357_v34  }
  0x3d   :  { %392 = vperm.xlu1 %508, %v358_v36  }
  0x3e   :  { %503 = vmatpush.xpose.msk.msra.mxu2 %vm100_vm0, %v28_v35  ;;  %504 = vmatpush.xpose.msk.msra.mxu3 %vm100_vm0, %v28_v35 }
  0x3f   :  { %456 = vmatpush.xpose.msk.msra.mxu0 %vm100_vm0, %v28_v35 }
  0x41   :  { %459 = vmatmul.msk.f32.vlgmr.msra.gmra.mxu2 %vm100_vm0, %v46_v37  ;;  %462 = vmatmul.msk.f32.vlgmr.msra.gmra.mxu3 %vm100_vm0, %v49_v38 }
  0x42   :  { %457 = vmatmul.msk.f32.vlgmr.msra.gmra.mxu0 %vm100_vm0, %v44_v39 }
  0x43   :  { %397 = vperm.xlu2 %509, %v359_v48  }
  0x49   :  { %460 = vmatmul.msk.f32.gmra.mxu2 %vm100_vm0, %v47_v41  ;;  %463 = vmatmul.msk.f32.gmra.mxu3 %vm100_vm0, %v50_v42 }
  0x4a   :  { %458 = vmatmul.msk.f32.gmra.mxu0 %vm100_vm0, %v45_v43 }
  0x51   :  { %461 = vmatmul.msk.f32.gmra.mxu2 %vm100_vm0, %v48_v45  ;;  %464 = vmatmul.msk.f32.gmra.mxu3 %vm100_vm0, %v51_v46 }
  0x65   :  { %v78_v55 = vpop.permute.xlu2 %77 }
  0x6d   :  { %v73_v2 = vpop.permute.xlu2 %72 }
  0x75   :  { %v241_v27 = vpop.permute.xlu2 %240 }
  0x76   :  { %v98_v51 = vpop.permute.xlu0 %97 }
  0x77   :  { %v88_v53 = vpop.permute.xlu1 %87 }
  0x7d   :  { %v256_v32 = vpop.permute.xlu2 %255 }
  0x7e   :  { %v93_v58 = vpop.permute.xlu0 %92 }
  0x7f   :  { %v83_v61 = vpop.permute.xlu1 %82 }
  0x85   :  { %v363_v36 = vpop.permute.xlu2 %362 }
  0x86   :  { %v68_v6 = vpop.permute.xlu0 %67 }
  0x87   :  { %v63_v9 = vpop.permute.xlu1 %62 }
  0x8d   :  { %v373_v44 = vpop.permute.xlu2 %372 }
  0x8e   :  { %v246_v29 = vpop.permute.xlu0 %245 }
  0x8f   :  { %v251_v30 = vpop.permute.xlu1 %250 }
  0x96   :  { %v261_v33 = vpop.permute.xlu0 %260 }
  0x97   :  { %v266_v34 = vpop.permute.xlu1 %265 }
  0x9e   :  { %v368_v37 = vpop.permute.xlu0 %367 }
  0x9f   :  { %v271_v41 = vpop.permute.xlu1 %270 }
  0xbf   :  { %v190_v56 = vpop.f32.mrf.mxu0 }
  0xc0   :  { %v191_v11 = vadd.f32 %v190_v56, %v63_v9 }
  0xc4   :  { %v196_v49 = vpop.f32.mrf.mxu2  ;;  %v205_v50 = vpop.f32.mrf.mxu3 }
  0xc5   :  { %v206_v63 = vadd.f32 %v205_v50, %v88_v53  ;;  %v197_v5 = vadd.f32 %v196_v49, %v73_v2  ;;  %v276_v49 = vpop.permute.xlu0 %275  ;;  %v378_v53 = vpop.permute.xlu1 %377 }
  0xc7   :  { %v193_v3 = vpop.f32.mrf.mxu0 }
  0xc8   :  { %v194_v8 = vadd.f32 %v193_v3, %v68_v6 }
  0xcc   :  { %v208_v52 = vpop.f32.mrf.mxu3  ;;  %v199_v54 = vpop.f32.mrf.mxu2 }
  0xcd   :  { %v209_v60 = vadd.f32 %v208_v52, %v93_v58  ;;  %v200_v1 = vadd.f32 %v199_v54, %v78_v55 }
  0xd4   :  { %v211_v57 = vpop.f32.mrf.mxu3  ;;  %v202_v62 = vpop.f32.mrf.mxu2 }
  0xd5   :  { %v212_v59 = vadd.f32 %v211_v57, %v98_v51  ;;  %v203_v0 = vadd.f32 %v202_v62, %v83_v61 }
  0xd7   :  { %510 = vtanh.f32 %v212_v59  ;;  %v383_v59 = vpop.permute.xlu2 %382 }
  0xd8   :  { %512 = vtanh.f32 %v209_v60 }
  0xd9   :  { %514 = vtanh.f32 %v206_v63 }
  0xda   :  { %516 = vtanh.f32 %v203_v0 }
  0xdb   :  { %518 = vtanh.f32 %v200_v1 }
  0xdc   :  { %520 = vtanh.f32 %v197_v5 }
  0xdd   :  { %v511_v4 = vpop.eup %510  ;;  %522 = vtanh.f32 %v194_v8 }
  0xde   :  { %311 = vmatpush.msra.mxu1 %v511_v4  ;;  %v513_v7 = vpop.eup %512  ;;  %524 = vtanh.f32 %v191_v11  ;;  %v388_v4 = vpop.permute.xlu0 %387 }
  0xdf   :  { %v515_v10 = vpop.eup %514 }
  0xe0   :  { %312 = vmatpush.msra.mxu1 %v513_v7  ;;  %v517_v12 = vpop.eup %516  ;;  %v393_v7 = vpop.permute.xlu1 %392 }
  0xe1   :  { %v519_v13 = vpop.eup %518 }
  0xe2   :  { %313 = vmatpush.msra.mxu1 %v515_v10  ;;  %v521_v14 = vpop.eup %520 }
  0xe3   :  { %v523_v15 = vpop.eup %522 }
  0xe4   :  { %314 = vmatpush.msra.mxu1 %v517_v12  ;;  %v525_v17 = vpop.eup %524  ;;  %v398_v12 = vpop.permute.xlu2 %397 }
  0xe6   :  { %315 = vmatpush.msra.mxu1 %v519_v13 }
  0xe8   :  { %316 = vmatpush.msra.mxu1 %v521_v14 }
  0xea   :  { %317 = vmatpush.msra.mxu1 %v523_v15 }
  0xec   :  { %318 = vmatpush.msra.mxu1 %v525_v17 }
  0xed   :  { %465 = vmatmul.msk.f32.vlgmr.msra.gmra.mxu1 %vm278_vm1, %v222_v16 }
  0xf5   :  { %466 = vmatmul.msk.f32.gmra.mxu1 %vm278_vm1, %v223_v18 }
  0xfd   :  { %467 = vmatmul.msk.f32.gmra.mxu1 %vm278_vm1, %v224_v19 }
 0x105   :  { %468 = vmatmul.msk.f32.gmra.mxu1 %vm278_vm1, %v225_v20 }
 0x10d   :  { %469 = vmatmul.msk.f32.gmra.mxu1 %vm278_vm1, %v226_v21  ;;  %v422_v21 = vstv %s854_s6 }
 0x115   :  { %470 = vmatmul.msk.f32.gmra.mxu1 %vm278_vm1, %v227_v22 }
 0x11d   :  { %471 = vmatmul.msk.f32.gmra.mxu1 %vm278_vm1, %v228_v23 }
 0x125   :  { %472 = vmatmul.msk.f32.gmra.mxu1 %vm278_vm1, %v229_v24 }
 0x16a   :  { %v320_v25 = vpop.f32.mrf.mxu1 }
 0x16b   :  { %v321_v39 = vadd.f32 %v320_v25, %v241_v27 }
 0x172   :  { %v323_v26 = vpop.f32.mrf.mxu1 }
 0x173   :  { %v324_v38 = vadd.f32 %v323_v26, %v246_v29 }
 0x175   :  { %526 = vtanh.f32 %v324_v38 }
 0x176   :  { %528 = vtanh.f32 %v321_v39 }
 0x17a   :  { %v326_v28 = vpop.f32.mrf.mxu1 }
 0x17b   :  { %v327_v42 = vadd.f32 %v326_v28, %v251_v30  ;;  %v527_v48 = vpop.eup %526 }
 0x17c   :  { %v529_v51 = vpop.eup %528  ;;  %v401_v54 = vmul.f32 %v527_v48, %v368_v37 }
 0x17d   :  { %530 = vtanh.f32 %v327_v42  ;;  %v400_v56 = vmul.f32 %v529_v51, %v363_v36 }
 0x17f   :  { %v408_v60 = vadd.f32 %v401_v54, %v400_v56 }
 0x182   :  { %v329_v31 = vpop.f32.mrf.mxu1 }
 0x183   :  { %v330_v43 = vadd.f32 %v329_v31, %v256_v32  ;;  %v531_v52 = vpop.eup %530 }
 0x184   :  { %v402_v57 = vmul.f32 %v531_v52, %v373_v44 }
 0x185   :  { %532 = vtanh.f32 %v330_v43 }
 0x186   :  { %v409_v1 = vadd.f32 %v408_v60, %v402_v57 }
 0x18a   :  { %v332_v35 = vpop.f32.mrf.mxu1 }
 0x18b   :  { %v333_v45 = vadd.f32 %v332_v35, %v261_v33  ;;  %v533_v55 = vpop.eup %532 }
 0x18c   :  { %v403_v61 = vmul.f32 %v533_v55, %v378_v53 }
 0x18d   :  { %534 = vtanh.f32 %v333_v45 }
 0x18e   :  { %v410_v5 = vadd.f32 %v409_v1, %v403_v61 }
 0x192   :  { %v335_v40 = vpop.f32.mrf.mxu1 }
 0x193   :  { %v336_v46 = vadd.f32 %v335_v40, %v266_v34  ;;  %v535_v58 = vpop.eup %534 }
 0x194   :  { %v404_v2 = vmul.f32 %v535_v58, %v383_v59 }
 0x195   :  { %536 = vtanh.f32 %v336_v46 }
 0x196   :  { %v411_v8 = vadd.f32 %v410_v5, %v404_v2 }
 0x19a   :  { %v338_v47 = vpop.f32.mrf.mxu1 }
 0x19b   :  { %v339_v50 = vadd.f32 %v338_v47, %v271_v41  ;;  %v537_v63 = vpop.eup %536 }
 0x19c   :  { %v405_v6 = vmul.f32 %v537_v63, %v388_v4 }
 0x19d   :  { %538 = vtanh.f32 %v339_v50 }
 0x19e   :  { %v412_v10 = vadd.f32 %v411_v8, %v405_v6 }
 0x1a2   :  { %v341_v62 = vpop.f32.mrf.mxu1 }
 0x1a3   :  { %v342_v0 = vadd.f32 %v341_v62, %v276_v49  ;;  %v539_v3 = vpop.eup %538 }
 0x1a4   :  { %v406_v9 = vmul.f32 %v539_v3, %v393_v7 }
 0x1a5   :  { %540 = vtanh.f32 %v342_v0 }
 0x1a6   :  { %v413_v13 = vadd.f32 %v412_v10, %v406_v9 }
 0x1ab   :  { %v541_v11 = vpop.eup %540 }
 0x1ac   :  { %v407_v14 = vmul.f32 %v541_v11, %v398_v12 }
 0x1ae   :  { %v414_v15 = vadd.f32 %v413_v13, %v407_v14 }
 0x1b0   :  { %v415_v16 = vrot.slane %v414_v15, 4 }
 0x1b2   :  { %v416_v17 = vadd.f32 %v415_v16, %v414_v15 }
 0x1b4   :  { %v417_v18 = vrot.slane %v416_v17, 2 }
 0x1b6   :  { %v418_v19 = vadd.f32 %v417_v18, %v416_v17 }
 0x1b8   :  { %v419_v20 = vrot.slane %v418_v19, 1 }
 0x1ba   :  { %v420_v22 = vadd.f32 %v419_v20, %v418_v19 }
 0x1bc   :  { %v423_v23 = vadd.f32 %v422_v21, %v420_v22 }
 0x1be   :  { %424 = vst [vmem:[#allocation3] sm:$0x1] %v423_v23 }
 0x1bf   :  { %435 = dma.vmem_to_hbm [thread:$0]  %s431_s14, 16, %s433_s17, [#allocation4]  }
 0x1c0   :  { %566 = dma.done.wait [#allocation4], 16  }
 0x1c1   :  { %567 = vsyncadd [#allocation4], 4294967280 }
 0x1c2   :  { %440 = vsyncpa [#allocation4], 1 }

</bundles_post_ra>
